<compile_context>
chip_gen: v7x
topology: tpu7x:2x2x1
jax: 0.10.0
libtpu: 0.0.40
codegen_flags: <defaults>
</compile_context>

<pallas_src>
import functools

import jax
import jax.numpy as jnp
from jax.experimental import pallas as pl
from jax.experimental.pallas import tpu as pltpu


def _actor_kernel(x_ref, w1_ref, b1_ref, w2_ref, b2_ref, w3_ref, b3_ref, o_ref):
    # Fused hot path: 3 MXU matmuls (compute-dtype in, f32 accumulate) with
    # bias / ReLU in f32 on the VPU and tanh on the EUP.
    x = x_ref[...]

    h1 = jnp.dot(x, w1_ref[...], preferred_element_type=jnp.float32) + b1_ref[...]
    h1 = jnp.maximum(h1, 0.0).astype(x.dtype)          # ReLU (f32), recast for MXU

    h2 = jnp.dot(h1, w2_ref[...], preferred_element_type=jnp.float32) + b2_ref[...]
    h2 = jnp.maximum(h2, 0.0).astype(x.dtype)          # ReLU (f32), recast for MXU

    h3 = jnp.dot(h2, w3_ref[...], preferred_element_type=jnp.float32) + b3_ref[...]
    o_ref[...] = jnp.tanh(h3).astype(o_ref.dtype)      # tanh in f32, cast at store


def _round_up(n, m):
    return ((n + m - 1) // m) * m


@functools.partial(jax.jit, static_argnames=("batch_tile", "compute_dtype"))
def default_dactor_forward(x, params, batch_tile=512, compute_dtype=jnp.bfloat16):
    """Forward pass of DefaultDActor.

    x:       (B, state_dim) float32
    params:  dict with w1 (S,H1), b1 (1,H1), w2 (H1,H2), b2 (1,H2),
             w3 (H2,A), b3 (1,A)  -- weights already transposed to (in, out).
    returns: (B, action_dim) in x.dtype, values in (-1, 1)
    """
    B, S = x.shape
    H1 = params["w1"].shape[1]
    H2 = params["w2"].shape[1]
    A = params["w3"].shape[1]
    out_dtype = x.dtype

    # Effective batch tile: multiple of 8 sublanes, capped so the grid has
    # >= 2 steps when the batch allows it (megacore sharding on v7x), and never
    # larger than requested (bounds vreg / spill pressure).
    bt = min(_round_up(batch_tile, 8), max(8, _round_up(pl.cdiv(B, 2), 8)))
    grid_len = pl.cdiv(B, bt)
    B_pad = grid_len * bt

    # Cast matmul operands to the compute dtype (bf16 by default); biases stay
    # f32 and are added to the f32 accumulator inside the kernel.
    xc = x if x.dtype == compute_dtype else x.astype(compute_dtype)
    if B_pad != B:
        xc = jnp.pad(xc, ((0, B_pad - B), (0, 0)))
    w1 = params["w1"].astype(compute_dtype)
    w2 = params["w2"].astype(compute_dtype)
    w3 = params["w3"].astype(compute_dtype)
    b1 = params["b1"].astype(jnp.float32)
    b2 = params["b2"].astype(jnp.float32)
    b3 = params["b3"].astype(jnp.float32)

    rep = lambda i: (0, 0)  # weights/biases: same block every step -> DMA'd once

    itemsize = jnp.dtype(compute_dtype).itemsize
    bytes_accessed = (
        B_pad * S * itemsize                                  # x tiles
        + (S * H1 + H1 * H2 + H2 * A) * itemsize              # weights
        + (H1 + H2 + A) * 4                                   # biases (f32)
        + B_pad * A * jnp.dtype(out_dtype).itemsize           # output
    )
    cost = pl.CostEstimate(
        flops=2 * B_pad * (S * H1 + H1 * H2 + H2 * A),
        transcendentals=B_pad * A,
        bytes_accessed=bytes_accessed,
    )

    out = pl.pallas_call(
        _actor_kernel,
        out_shape=jax.ShapeDtypeStruct((B_pad, A), out_dtype),
        grid=(grid_len,),
        in_specs=[
            pl.BlockSpec((bt, S), lambda i: (i, 0)),   # x tile (streamed)
            pl.BlockSpec((S, H1), rep),                # w1 (resident)
            pl.BlockSpec((1, H1), rep),                # b1
            pl.BlockSpec((H1, H2), rep),               # w2
            pl.BlockSpec((1, H2), rep),                # b2
            pl.BlockSpec((H2, A), rep),                # w3
            pl.BlockSpec((1, A), rep),                 # b3
        ],
        out_specs=pl.BlockSpec((bt, A), lambda i: (i, 0)),
        compiler_params=pltpu.CompilerParams(
            dimension_semantics=("parallel",),
        ),
        cost_estimate=cost,
    )(xc, w1, b1, w2, b2, w3, b3)

    return out[:B] if B_pad != B else out


def init_params(key, state_dim, action_dim, hidden_dim=128, hidden_multiplier=2,
                dtype=jnp.float32):
    """PyTorch-style (uniform ±1/sqrt(fan_in)) init; weights stored (in, out)."""
    h1 = hidden_dim * hidden_multiplier
    h2 = hidden_dim
    dims = [(state_dim, h1), (h1, h2), (h2, action_dim)]
    params = {}
    keys = jax.random.split(key, 2 * len(dims))
    for n, (fan_in, fan_out) in enumerate(dims, start=1):
        bound = 1.0 / jnp.sqrt(fan_in)
        kw, kb = keys[2 * (n - 1)], keys[2 * (n - 1) + 1]
        params[f"w{n}"] = jax.random.uniform(
            kw, (fan_in, fan_out), dtype, minval=-bound, maxval=bound)
        params[f"b{n}"] = jax.random.uniform(
            kb, (1, fan_out), dtype, minval=-bound, maxval=bound)
    return params


def _reference_forward(x, params):
    h1 = jnp.maximum(x @ params["w1"] + params["b1"], 0.0)
    h2 = jnp.maximum(h1 @ params["w2"] + params["b2"], 0.0)
    return jnp.tanh(h2 @ params["w3"] + params["b3"])


if __name__ == "__main__":
    # Small shapes consistent with DefaultDActor(state_dim=16, action_dim=8,
    # hidden_dim=32, hidden_multiplier=2):  16 -> 64 -> 32 -> 8.
    state_dim, action_dim = 16, 8
    hidden_dim, hidden_multiplier = 32, 2

    key = jax.random.PRNGKey(0)
    k_params, k_x1, k_x2 = jax.random.split(key, 3)

    params = init_params(k_params, state_dim, action_dim,
                         hidden_dim=hidden_dim,
                         hidden_multiplier=hidden_multiplier)

    # --- check 1: tiny batch, f32 compute path (tight tolerance) ---
    x_small = jax.random.normal(k_x1, (8, state_dim), dtype=jnp.float32)
    out_f32 = default_dactor_forward(x_small, params, compute_dtype=jnp.float32)
    out_f32 = jax.block_until_ready(out_f32)
    ref_small = _reference_forward(x_small, params)
    assert out_f32.shape == (8, action_dim)
    assert jnp.allclose(out_f32, ref_small, atol=1e-5, rtol=1e-5), "f32 mismatch"
    assert jnp.all(jnp.abs(out_f32) <= 1.0)

    # --- check 2: ragged batch, bf16 compute path, multi-step grid + padding ---
    x_big = jax.random.normal(k_x2, (200, state_dim), dtype=jnp.float32)
    out_bf16 = default_dactor_forward(x_big, params)  # default bf16, bt capped
    out_bf16 = jax.block_until_ready(out_bf16)
    ref_big = _reference_forward(x_big, params)
    assert out_bf16.shape == (200, action_dim)
    assert jnp.allclose(out_bf16, ref_big, atol=2e-2, rtol=2e-2), "bf16 mismatch"
    assert jnp.all(jnp.abs(out_bf16) <= 1.0)

    print("KERNEL_OK")
</pallas_src>

<mosaic_0001>
module attributes {stable_mosaic.version = 11 : i64} {
  func.func @_actor_kernel(%arg0: i32, %arg1: memref<8x16xf32, #tpu.memory_space<vmem>>, %arg2: memref<16x64xf32, #tpu.memory_space<vmem>>, %arg3: memref<1x64xf32, #tpu.memory_space<vmem>>, %arg4: memref<64x32xf32, #tpu.memory_space<vmem>>, %arg5: memref<1x32xf32, #tpu.memory_space<vmem>>, %arg6: memref<32x8xf32, #tpu.memory_space<vmem>>, %arg7: memref<1x8xf32, #tpu.memory_space<vmem>>, %arg8: memref<8x8xf32, #tpu.memory_space<vmem>>) attributes {dimension_semantics = [#tpu.dimension_semantics<parallel>], iteration_bounds = array<i64: 1>, scalar_prefetch = 0 : i64, scratch_operands = 0 : i64, tpu.core_type = #tpu.core_type<tc>, window_params = [{transform_indices = @transform_0, window_bounds = array<i64: 8, 16>}, {pipeline_mode = #tpu.pipeline_mode<synchronous>, transform_indices = @transform_1, window_bounds = array<i64: 16, 64>}, {pipeline_mode = #tpu.pipeline_mode<synchronous>, transform_indices = @transform_2, window_bounds = array<i64: 1, 64>}, {pipeline_mode = #tpu.pipeline_mode<synchronous>, transform_indices = @transform_3, window_bounds = array<i64: 64, 32>}, {pipeline_mode = #tpu.pipeline_mode<synchronous>, transform_indices = @transform_4, window_bounds = array<i64: 1, 32>}, {pipeline_mode = #tpu.pipeline_mode<synchronous>, transform_indices = @transform_5, window_bounds = array<i64: 32, 8>}, {pipeline_mode = #tpu.pipeline_mode<synchronous>, transform_indices = @transform_6, window_bounds = array<i64: 1, 8>}, {transform_indices = @transform_7, window_bounds = array<i64: 8, 8>}]} {
    %c0 = arith.constant 0 : index
    %c0_0 = arith.constant 0 : index
    %0 = vector.load %arg1[%c0, %c0_0] : memref<8x16xf32, #tpu.memory_space<vmem>>, vector<8x16xf32>
    %c0_1 = arith.constant 0 : index
    %c0_2 = arith.constant 0 : index
    %1 = vector.load %arg2[%c0_1, %c0_2] : memref<16x64xf32, #tpu.memory_space<vmem>>, vector<16x64xf32>
    %cst = arith.constant dense<0.000000e+00> : vector<8x64xf32>
    %2 = tpu.matmul %0, %1, %cst {dimension_numbers = #tpu.dot_dimension_numbers<[1], [0], [0], [1], [0, 0, 1, 1], [], []>} : vector<8x16xf32>, vector<16x64xf32>, vector<8x64xf32> -> vector<8x64xf32>
    %c0_3 = arith.constant 0 : index
    %c0_4 = arith.constant 0 : index
    %3 = vector.load %arg3[%c0_3, %c0_4] : memref<1x64xf32, #tpu.memory_space<vmem>>, vector<1x64xf32>
    %4 = vector.broadcast %3 : vector<1x64xf32> to vector<8x64xf32>
    %5 = arith.addf %2, %4 : vector<8x64xf32>
    %cst_5 = arith.constant 0.000000e+00 : f32
    %6 = vector.broadcast %cst_5 : f32 to vector<8x64xf32>
    %7 = arith.maximumf %5, %6 : vector<8x64xf32>
    %c0_6 = arith.constant 0 : index
    %c0_7 = arith.constant 0 : index
    %8 = vector.load %arg4[%c0_6, %c0_7] : memref<64x32xf32, #tpu.memory_space<vmem>>, vector<64x32xf32>
    %cst_8 = arith.constant dense<0.000000e+00> : vector<8x32xf32>
    %9 = tpu.matmul %7, %8, %cst_8 {dimension_numbers = #tpu.dot_dimension_numbers<[1], [0], [0], [1], [0, 0, 1, 1], [], []>} : vector<8x64xf32>, vector<64x32xf32>, vector<8x32xf32> -> vector<8x32xf32>
    %c0_9 = arith.constant 0 : index
    %c0_10 = arith.constant 0 : index
    %10 = vector.load %arg5[%c0_9, %c0_10] : memref<1x32xf32, #tpu.memory_space<vmem>>, vector<1x32xf32>
    %11 = vector.broadcast %10 : vector<1x32xf32> to vector<8x32xf32>
    %12 = arith.addf %9, %11 : vector<8x32xf32>
    %cst_11 = arith.constant 0.000000e+00 : f32
    %13 = vector.broadcast %cst_11 : f32 to vector<8x32xf32>
    %14 = arith.maximumf %12, %13 : vector<8x32xf32>
    %c0_12 = arith.constant 0 : index
    %c0_13 = arith.constant 0 : index
    %15 = vector.load %arg6[%c0_12, %c0_13] : memref<32x8xf32, #tpu.memory_space<vmem>>, vector<32x8xf32>
    %cst_14 = arith.constant dense<0.000000e+00> : vector<8x8xf32>
    %16 = tpu.matmul %14, %15, %cst_14 {dimension_numbers = #tpu.dot_dimension_numbers<[1], [0], [0], [1], [0, 0, 1, 1], [], []>} : vector<8x32xf32>, vector<32x8xf32>, vector<8x8xf32> -> vector<8x8xf32>
    %c0_15 = arith.constant 0 : index
    %c0_16 = arith.constant 0 : index
    %17 = vector.load %arg7[%c0_15, %c0_16] : memref<1x8xf32, #tpu.memory_space<vmem>>, vector<1x8xf32>
    %18 = vector.broadcast %17 : vector<1x8xf32> to vector<8x8xf32>
    %19 = arith.addf %16, %18 : vector<8x8xf32>
    %20 = math.tanh %19 : vector<8x8xf32>
    %c0_17 = arith.constant 0 : index
    %c0_18 = arith.constant 0 : index
    %21 = vector.load %arg8[%c0_17, %c0_18] : memref<8x8xf32, #tpu.memory_space<vmem>>, vector<8x8xf32>
    tpu.vector_store %arg8[%c0_17, %c0_18], %20 {strides = array<i32>} : memref<8x8xf32, #tpu.memory_space<vmem>>, vector<8x8xf32>,
    return
  }
  func.func @transform_0(%arg0: i32) -> (i32, i32) {
    %c0_i32 = arith.constant 0 : i32
    %c0_i32_0 = arith.constant 0 : i32
    return %arg0, %c0_i32 : i32, i32
  }
  func.func @transform_1(%arg0: i32) -> (i32, i32) {
    %c0_i32 = arith.constant 0 : i32
    %c0_i32_0 = arith.constant 0 : i32
    %c0_i32_1 = arith.constant 0 : i32
    return %c0_i32, %c0_i32_0 : i32, i32
  }
  func.func @transform_2(%arg0: i32) -> (i32, i32) {
    %c0_i32 = arith.constant 0 : i32
    %c0_i32_0 = arith.constant 0 : i32
    %c0_i32_1 = arith.constant 0 : i32
    return %c0_i32, %c0_i32_0 : i32, i32
  }
  func.func @transform_3(%arg0: i32) -> (i32, i32) {
    %c0_i32 = arith.constant 0 : i32
    %c0_i32_0 = arith.constant 0 : i32
    %c0_i32_1 = arith.constant 0 : i32
    return %c0_i32, %c0_i32_0 : i32, i32
  }
  func.func @transform_4(%arg0: i32) -> (i32, i32) {
    %c0_i32 = arith.constant 0 : i32
    %c0_i32_0 = arith.constant 0 : i32
    %c0_i32_1 = arith.constant 0 : i32
    return %c0_i32, %c0_i32_0 : i32, i32
  }
  func.func @transform_5(%arg0: i32) -> (i32, i32) {
    %c0_i32 = arith.constant 0 : i32
    %c0_i32_0 = arith.constant 0 : i32
    %c0_i32_1 = arith.constant 0 : i32
    return %c0_i32, %c0_i32_0 : i32, i32
  }
  func.func @transform_6(%arg0: i32) -> (i32, i32) {
    %c0_i32 = arith.constant 0 : i32
    %c0_i32_0 = arith.constant 0 : i32
    %c0_i32_1 = arith.constant 0 : i32
    return %c0_i32, %c0_i32_0 : i32, i32
  }
  func.func @transform_7(%arg0: i32) -> (i32, i32) {
    %c0_i32 = arith.constant 0 : i32
    %c0_i32_0 = arith.constant 0 : i32
    return %arg0, %c0_i32 : i32, i32
  }
}

</mosaic_0001>

<bundles_post_ra>
// kernel: default_dactor_forward.1
= control target key start
LH: loop header
LB: loop body
LE: loop exit
PB: predicated region body
PF: predicated region fallthrough
CT: control target
= control target key end

     0   :  { %v415_v2 = vmov 0.0|0.0   ;;  %vm416_vm0 = vmmov 0   ;;  %v417_v4 = vmov 0.0   ;;  %vm37_vm1 = vcmask 130048   ;;  %s528_s0 = inlined_call_operand.vmem [shape: f32[8,16], index: 0, kind: input, shape index: {}]   ;;  %s529_s1 = inlined_call_operand.vmem [shape: f32[16,64], index: 1, kind: input, shape index: {}]   ;;  %s530_s2 = inlined_call_operand.vmem [shape: f32[1,64], index: 2, kind: input, shape index: {}]   ;;  %s531_s3 = inlined_call_operand.vmem [shape: f32[64,32], index: 3, kind: input, shape index: {}]   ;;  %s532_s4 = inlined_call_operand.vmem [shape: f32[1,32], index: 4, kind: input, shape index: {}]   ;;  %s533_s5 = inlined_call_operand.vmem [shape: f32[32,8], index: 5, kind: input, shape index: {}]   ;;  %s534_s6 = inlined_call_operand.vmem [shape: f32[1,8], index: 6, kind: input, shape index: {}]   ;;  %s535_s7 = inlined_call_operand.hbm [shape: f32[8,8], index: 7, kind: output, shape index: {}]  }
   0x1   :  { %v28_v0 = vld [vmem:[%s529_s1] sm:$0xff]  ;;  %v29_v1 = vld [vmem:[%s529_s1 + $0x8] sm:$0xff]  ;;  %364 = vmatprep.subr.bf16.mxu0 %v415_v2  ;;  %331 = vmatprep.mubr.msk.f32.mxu0 %vm416_vm0, %v417_v4  ;;  %v114_v7 = vld [vmem:[%s531_s3 + $0x10] sm:$0xff] }
   0x2   :  { %v365_v3 = vpack.c.bf16 %v29_v1, %v28_v0  ;;  %v112_v5 = vld [vmem:[%s531_s3] sm:$0xff]  ;;  %v113_v6 = vld [vmem:[%s531_s3 + $0x8] sm:$0xff]  ;;  %367 = vmatprep.subr.bf16.mxu1 %v415_v2  ;;  %v115_v9 = vld [vmem:[%s531_s3 + $0x18] sm:$0xff]  ;;  %350 = vmatprep.mubr.msk.f32.mxu1 %vm416_vm0, %v417_v4 }
   0x3   :  { %v368_v8 = vpack.c.bf16 %v113_v6, %v112_v5  ;;  %v27_v10 = vld [vmem:[%s528_s0] sm:$0xff] }
   0x4   :  { %366 = vmatpush3.bf16.msra.mxu0 %v365_v3 }
   0x5   :  { %12 = vsyncpa [#allocation3], 0  ;;  %369 = vmatpush3.bf16.msra.mxu1 %v368_v8  ;;  %v371_v11 = vpack.c.bf16 %v115_v9, %v114_v7  ;;  %379 = vmatprep.subr.bf16.mxu0 %v415_v2  ;;  %v116_v12 = vld [vmem:[%s531_s3 + $0x20] sm:$0xff]  ;;  %v117_v13 = vld [vmem:[%s531_s3 + $0x28] sm:$0xff]  ;;  %vm127_vm2 = vcmask 523264   ;;  %vm213_vm3 = vcmask 261120  }
   0x6   :  { %370 = vmatprep.subr.bf16.mxu1 %v415_v2  ;;  %v374_v14 = vpack.c.bf16 %v117_v13, %v116_v12  ;;  %v118_v15 = vld [vmem:[%s531_s3 + $0x30] sm:$0xff]  ;;  %v119_v16 = vld [vmem:[%s531_s3 + $0x38] sm:$0xff]  ;;  %v202_v18 = vld [vmem:[%s533_s5] sm:$0xff]  ;;  %vm288_vm4 = vcmask 64512  }
   0x7   :  { %332 = vmatmul.mubr.msk.f32.vlgmr.msra.gmra.mrb[0].mxu0 %vm37_vm1, %v27_v10  ;;  %v377_v17 = vpack.c.bf16 %v119_v16, %v118_v15  ;;  %v203_v19 = vld [vmem:[%s533_s5 + $0x8] sm:$0xff]  ;;  %v304_v21 = vld [vmem:[%s530_s2] ss:$0 sm:$0xff]  ;;  %v204_v26 = vld [vmem:[%s533_s5 + $0x10] sm:$0xff] }
   0x8   :  { %361 = vmatprep.mubr.msk.f32.mxu0 %vm416_vm0, %v417_v4  ;;  %v380_v20 = vpack.c.bf16 %v203_v19, %v202_v18  ;;  %v205_v27 = vld [vmem:[%s533_s5 + $0x18] sm:$0xff]  ;;  %v306_v29 = vld [vmem:[%s532_s4] ss:$0 sm:$0xff]  ;;  %s418_s5 = smov [#allocation2]  }
   0x9   :  { %372 = vmatpush3.bf16.msra.mxu1 %v371_v11  ;;  %v383_v28 = vpack.c.bf16 %v205_v27, %v204_v26  ;;  %v308_v34 = vld [vmem:[%s534_s6] ss:$0 sm:$0xff]  ;;  %s296_s10 = sshll.u32 %s418_s5, 4  ;;  %s297_s10 = int_to_ptr.vmem [resolvable:$true] %s296_s10 }
   0xa   :  { %373 = vmatprep.subr.bf16.mxu1 %v415_v2  ;;  %381 = vmatpush3.bf16.msra.mxu0 %v380_v20  ;;  %s391_s4 = scalar_lea.vmem %s297_s10, 128  ;;  %p396_p1 = scmp.lt.s32.totalorder %s297_s10, %s297_s10 }
   0xb   :  { %382 = vmatprep.subr.bf16.mxu0 %v415_v2  ;;  %p392_p0 = scmp.ne.s32.totalorder %s297_s10, %s391_s4  ;;  %p397_p2 = scmp.lt.s32.totalorder %s391_s4, %s391_s4 }
   0xd   :  { %375 = vmatpush3.bf16.msra.mxu1 %v374_v14  ;;  %p398_p3 = por %p397_p2, %p396_p1 }
   0xe   :  { %376 = vmatprep.subr.bf16.mxu1 %v415_v2  ;;  %384 = vmatpush3.bf16.msra.mxu0 %v383_v28 }
   0xf   :  { %p399_p4 = pnand %p398_p3, %p392_p0 }
  0x11   :  { %378 = vmatpush3.bf16.msra.mxu1 %v377_v17 }
  0xda   :  { %v107_v22 = vpop.f32.mrb[0].mxu0 }
  0xdb   :  { %v108_v23 = vadd.f32 %v304_v21, %v107_v22  ;;  %v333_v24 = vpop.f32.mrb[1].mxu0 }
  0xdd   :  { %v111_v25 = vmax.f32 %v108_v23, 0.0 }
  0xdf   :  { %351 = vmatmul.mubr.msk.f32.vlgmr.msra.gmra.mrb[0].mxu1 %vm127_vm2, %v111_v25 }
 0x1b2   :  { %v197_v30 = vpop.f32.mrb[0].mxu1 }
 0x1b3   :  { %v198_v31 = vadd.f32 %v306_v29, %v197_v30  ;;  %v352_v32 = vpop.f32.mrb[1].mxu1 }
 0x1b5   :  { %v201_v33 = vmax.f32 %v198_v31, 0.0 }
 0x1b7   :  { %362 = vmatmul.mubr.msk.f32.vlgmr.msra.gmra.mrb[2].mxu0 %vm213_vm3, %v201_v33 }
 0x28a   :  { %v283_v35 = vpop.f32.mrb[2].mxu0 }
 0x28b   :  { %v284_v36 = vadd.f32 %v308_v34, %v283_v35  ;;  %v363_v37 = vpop.f32.mrb[3].mxu0 }
 0x28d   :  { %389 = vtanh.f32 %v284_v36 }
 0x297   :  { %v390_v38 = vpop.eup %389 }
 0x298   :  { %289 = vst.msk [vmem:[#allocation2] sm:$0xff] %vm288_vm4, %v390_v38 }
 0x299   :  { %402 = shalt.err (!%p399_p4)
}
 0x29a   :  { %s403_s6 = scalar_lea.hbm %s535_s7, 128 }
 0x29b   :  { %p404_p5 = scmp.ne.s32.totalorder %s535_s7, %s403_s6  ;;  %p407_p6 = scmp.lt.u32.totalorder %s403_s6, %s535_s7 }
 0x29d   :  { %p409_p7 = pnand %p407_p6, %p404_p5 }
 0x29f   :  { %412 = shalt.err (!%p409_p7)
}
 0x2a0   :  { %299 = dma.vmem_to_hbm [thread:$0]  %s297_s10, 128, %s535_s7, [#allocation3]  }
 0x2a1   :  { %413 = dma.done.wait [#allocation3], 128  }
 0x2a2   :  { %414 = vsyncadd [#allocation3], 4294967168 }
 0x2a3   :  { %303 = vsyncpa [#allocation3], 1 }

</bundles_post_ra>
